<compile_context>
chip_gen: v7x
topology: tpu7x:2x2x1
jax: 0.10.0
libtpu: 0.0.40
codegen_flags: <defaults>
</compile_context>

<pallas_src>
import functools

import jax
import jax.numpy as jnp
from jax.experimental import pallas as pl
from jax.experimental.pallas import tpu as pltpu


def channel_gate_kernel(x_ref, w1_ref, b1_ref, w2_ref, b2_ref, o_ref, *, inv_hw):
    # x_ref: (Bt, C, HW)   w1_ref: (C, Cr)  b1_ref: (1, Cr)
    # w2_ref: (Cr, C)      b2_ref: (1, C)   o_ref: (Bt, C, HW)
    bt = x_ref.shape[0]
    x = x_ref[...]                                           # (Bt, C, HW), input dtype

    # Spatial pools, f32 accumulation.  HW is the true (unpadded) extent, so
    # no masking is needed for either pool.
    sum_pool = jnp.sum(x, axis=-1, dtype=jnp.float32)        # (Bt, C)
    max_pool = jnp.max(x, axis=-1).astype(jnp.float32)       # (Bt, C)
    avg_pool = sum_pool * inv_hw                             # (Bt, C)

    # Fused MLP over both pool branches and the whole batch tile:
    # one (2*Bt, C) @ (C, Cr) -> ReLU -> (2*Bt, Cr) @ (Cr, C) chain.
    pools = jnp.concatenate([avg_pool, max_pool], axis=0)    # (2*Bt, C)
    h = jnp.dot(pools, w1_ref[...], preferred_element_type=jnp.float32) + b1_ref[...]
    h = jnp.maximum(h, 0.0)                                  # (2*Bt, Cr)
    att = jnp.dot(h, w2_ref[...], preferred_element_type=jnp.float32) + b2_ref[...]
    scale = jax.nn.sigmoid(att[:bt] + att[bt:])              # (Bt, C)

    # Gating multiply in the input dtype (halves vreg traffic for bf16; for
    # bf16 inputs this differs from an f32 multiply by ~1 bf16 ulp).
    o_ref[...] = (x * scale[:, :, None].astype(x.dtype)).astype(o_ref.dtype)


def _pick_batch_tile(B, bytes_per_b, vmem_budget, weight_bytes):
    """Largest divisor of B whose block fits VMEM, stays MB-scale, grid>=2."""
    headroom = 2 << 20
    max_by_vmem = max(1, (vmem_budget - 2 * weight_bytes - headroom) // (4 * bytes_per_b))
    target = max(1, (8 << 20) // bytes_per_b)   # ~<=8 MiB per-step slab
    cap = min(max_by_vmem, target)
    if B >= 2:
        cap = min(cap, B // 2)                  # keep grid length >= 2 (v7x megacore)
    cap = max(1, min(cap, B))
    bt = 1
    for d in range(1, cap + 1):                 # largest divisor of B <= cap
        if B % d == 0:
            bt = d
    return bt


def channel_gate(x, w1, b1, w2, b2, *, donate_x=False):
    """x: (B, C, H, W) (NCHW, same as the PyTorch module).

    w1: (C, Cr), b1: (Cr,), w2: (Cr, C), b2: (C,)  (Linear weights stored as
    (in, out); transpose a PyTorch nn.Linear checkpoint before passing).
    """
    B, C, H, W = x.shape
    HW = H * W
    xf = x.reshape(B, C, HW)                    # free reshape; HW stays unpadded in HBM

    Cr = w1.shape[1]
    b1r = jnp.asarray(b1).reshape(1, Cr)
    b2r = jnp.asarray(b2).reshape(1, C)

    # Hardware-derived VMEM budget (~0.75x capacity): 48 MiB on v7x,
    # ~96 MiB on v5e/v6e.
    try:
        vmem_cap = int(pltpu.get_tpu_info().vmem_capacity_bytes)
    except Exception:
        vmem_cap = 64 << 20
    vmem_budget = vmem_cap * 3 // 4

    itemsize = jnp.dtype(x.dtype).itemsize
    bytes_per_b = C * HW * itemsize
    weight_bytes = int((w1.size + w2.size + b1r.size + b2r.size)
                       * jnp.dtype(w1.dtype).itemsize)

    Bt = _pick_batch_tile(B, bytes_per_b, vmem_budget, weight_bytes)
    nb = B // Bt

    block_bytes = Bt * bytes_per_b
    vmem_limit = int(min(max(4 * block_bytes + 2 * weight_bytes + (8 << 20), 32 << 20),
                         vmem_budget))

    kernel = functools.partial(channel_gate_kernel, inv_hw=1.0 / float(HW))

    out = pl.pallas_call(
        kernel,
        out_shape=jax.ShapeDtypeStruct((B, C, HW), x.dtype),
        grid_spec=pltpu.PrefetchScalarGridSpec(
            num_scalar_prefetch=0,
            grid=(nb,),
            in_specs=[
                pl.BlockSpec((Bt, C, HW), lambda b: (b, 0, 0)),
                pl.BlockSpec((C, Cr), lambda b: (0, 0)),
                pl.BlockSpec((1, Cr), lambda b: (0, 0)),
                pl.BlockSpec((Cr, C), lambda b: (0, 0)),
                pl.BlockSpec((1, C), lambda b: (0, 0)),
            ],
            out_specs=pl.BlockSpec((Bt, C, HW), lambda b: (b, 0, 0)),
        ),
        compiler_params=pltpu.CompilerParams(
            dimension_semantics=("parallel",),   # shards batch tiles across TCs on v7x
            vmem_limit_bytes=vmem_limit,
        ),
        input_output_aliases=({0: 0} if donate_x else {}),
    )(xf, w1, b1r, w2, b2r)

    return out.reshape(B, C, H, W)


def channel_gate_ref(x, w1, b1, w2, b2):
    """Pure-JAX reference replicating the PyTorch forward (pool_types=['avg','max'])."""
    B, C, H, W = x.shape
    xf = x.reshape(B, C, H * W).astype(jnp.float32)
    avg_pool = jnp.mean(xf, axis=-1)
    max_pool = jnp.max(xf, axis=-1)

    def mlp(p):
        h = jnp.maximum(p @ w1 + b1, 0.0)
        return h @ w2 + b2

    att = mlp(avg_pool) + mlp(max_pool)
    scale = jax.nn.sigmoid(att)[:, :, None, None]
    return x * scale


if __name__ == "__main__":
    # Small shapes consistent with the module: gate_channels=8, reduction_ratio=4.
    B, C = 2, 8
    Cr = C // 4

    key = jax.random.PRNGKey(0)
    kx, k1, k2, k3, k4, kx2 = jax.random.split(key, 6)

    # MLP parameters stored as (in, out).
    w1 = jax.random.normal(k1, (C, Cr), dtype=jnp.float32) * 0.1
    b1 = jax.random.normal(k2, (Cr,), dtype=jnp.float32) * 0.1
    w2 = jax.random.normal(k3, (Cr, C), dtype=jnp.float32) * 0.1
    b2 = jax.random.normal(k4, (C,), dtype=jnp.float32) * 0.1

    # Case 1: lane-aligned spatial size (16*16 = 256, multiple of 128).
    x = jax.random.normal(kx, (B, C, 16, 16), dtype=jnp.float32)
    out = jax.block_until_ready(channel_gate(x, w1, b1, w2, b2))
    ref = channel_gate_ref(x, w1, b1, w2, b2)
    assert out.shape == x.shape
    assert jnp.allclose(out, ref, atol=1e-5, rtol=1e-5), "mismatch vs reference (256)"

    # Case 2: ragged spatial size (7*7 = 49) exercising the unpadded full-extent path.
    x2 = jax.random.normal(kx2, (B, C, 7, 7), dtype=jnp.float32)
    out2 = jax.block_until_ready(channel_gate(x2, w1, b1, w2, b2))
    ref2 = channel_gate_ref(x2, w1, b1, w2, b2)
    assert out2.shape == x2.shape
    assert jnp.allclose(out2, ref2, atol=1e-5, rtol=1e-5), "mismatch vs reference (49)"

    print("KERNEL_OK")
</pallas_src>

<mosaic_0001>
module attributes {stable_mosaic.version = 11 : i64} {
  func.func @channel_gate_kernel(%arg0: i32, %arg1: memref<1x8x256xf32, #tpu.memory_space<vmem>>, %arg2: memref<8x2xf32, #tpu.memory_space<vmem>>, %arg3: memref<1x2xf32, #tpu.memory_space<vmem>>, %arg4: memref<2x8xf32, #tpu.memory_space<vmem>>, %arg5: memref<1x8xf32, #tpu.memory_space<vmem>>, %arg6: memref<1x8x256xf32, #tpu.memory_space<vmem>>) attributes {dimension_semantics = [#tpu.dimension_semantics<parallel>], iteration_bounds = array<i64: 2>, scalar_prefetch = 0 : i64, scratch_operands = 0 : i64, tpu.core_type = #tpu.core_type<tc>, window_params = [{transform_indices = @transform_0, window_bounds = array<i64: 1, 8, 256>}, {pipeline_mode = #tpu.pipeline_mode<synchronous>, transform_indices = @transform_1, window_bounds = array<i64: 8, 2>}, {pipeline_mode = #tpu.pipeline_mode<synchronous>, transform_indices = @transform_2, window_bounds = array<i64: 1, 2>}, {pipeline_mode = #tpu.pipeline_mode<synchronous>, transform_indices = @transform_3, window_bounds = array<i64: 2, 8>}, {pipeline_mode = #tpu.pipeline_mode<synchronous>, transform_indices = @transform_4, window_bounds = array<i64: 1, 8>}, {transform_indices = @transform_5, window_bounds = array<i64: 1, 8, 256>}]} {
    %c0 = arith.constant 0 : index
    %c0_0 = arith.constant 0 : index
    %c0_1 = arith.constant 0 : index
    %0 = vector.load %arg1[%c0, %c0_0, %c0_1] : memref<1x8x256xf32, #tpu.memory_space<vmem>>, vector<1x8x256xf32>
    %cst = arith.constant dense<0.000000e+00> : vector<1x8xf32>
    %1 = vector.multi_reduction <add>, %0, %cst [2] : vector<1x8x256xf32> to vector<1x8xf32>
    %cst_2 = arith.constant dense<0xFF800000> : vector<1x8xf32>
    %2 = vector.multi_reduction <maximumf>, %0, %cst_2 [2] : vector<1x8x256xf32> to vector<1x8xf32>
    %cst_3 = arith.constant 3.906250e-03 : f32
    %3 = vector.broadcast %cst_3 : f32 to vector<1x8xf32>
    %4 = arith.mulf %1, %3 : vector<1x8xf32>
    %5 = tpu.concatenate %4, %2 in 0 : vector<1x8xf32>, vector<1x8xf32> -> vector<2x8xf32>
    %c0_4 = arith.constant 0 : index
    %c0_5 = arith.constant 0 : index
    %6 = vector.load %arg2[%c0_4, %c0_5] : memref<8x2xf32, #tpu.memory_space<vmem>>, vector<8x2xf32>
    %cst_6 = arith.constant dense<0.000000e+00> : vector<2x2xf32>
    %7 = tpu.matmul %5, %6, %cst_6 {dimension_numbers = #tpu.dot_dimension_numbers<[1], [0], [0], [1], [0, 0, 1, 1], [], []>} : vector<2x8xf32>, vector<8x2xf32>, vector<2x2xf32> -> vector<2x2xf32>
    %c0_7 = arith.constant 0 : index
    %c0_8 = arith.constant 0 : index
    %8 = vector.load %arg3[%c0_7, %c0_8] : memref<1x2xf32, #tpu.memory_space<vmem>>, vector<1x2xf32>
    %9 = vector.broadcast %8 : vector<1x2xf32> to vector<2x2xf32>
    %10 = arith.addf %7, %9 : vector<2x2xf32>
    %cst_9 = arith.constant 0.000000e+00 : f32
    %11 = vector.broadcast %cst_9 : f32 to vector<2x2xf32>
    %12 = arith.maximumf %10, %11 : vector<2x2xf32>
    %c0_10 = arith.constant 0 : index
    %c0_11 = arith.constant 0 : index
    %13 = vector.load %arg4[%c0_10, %c0_11] : memref<2x8xf32, #tpu.memory_space<vmem>>, vector<2x8xf32>
    %cst_12 = arith.constant dense<0.000000e+00> : vector<2x8xf32>
    %14 = tpu.matmul %12, %13, %cst_12 {dimension_numbers = #tpu.dot_dimension_numbers<[1], [0], [0], [1], [0, 0, 1, 1], [], []>} : vector<2x2xf32>, vector<2x8xf32>, vector<2x8xf32> -> vector<2x8xf32>
    %c0_13 = arith.constant 0 : index
    %c0_14 = arith.constant 0 : index
    %15 = vector.load %arg5[%c0_13, %c0_14] : memref<1x8xf32, #tpu.memory_space<vmem>>, vector<1x8xf32>
    %16 = vector.broadcast %15 : vector<1x8xf32> to vector<2x8xf32>
    %17 = arith.addf %14, %16 : vector<2x8xf32>
    %18 = vector.extract_strided_slice %17 {offsets = [0, 0], sizes = [1, 8], strides = [1, 1]} : vector<2x8xf32> to vector<1x8xf32>
    %19 = vector.extract_strided_slice %17 {offsets = [1, 0], sizes = [1, 8], strides = [1, 1]} : vector<2x8xf32> to vector<1x8xf32>
    %20 = arith.addf %18, %19 : vector<1x8xf32>
    %21 = arith.negf %20 : vector<1x8xf32>
    %22 = math.exp %21 : vector<1x8xf32>
    %cst_15 = arith.constant 1.000000e+00 : f32
    %23 = vector.broadcast %cst_15 : f32 to vector<1x8xf32>
    %24 = arith.addf %23, %22 : vector<1x8xf32>
    %25 = arith.divf %23, %24 : vector<1x8xf32>
    %26 = vector.shape_cast %25 : vector<1x8xf32> to vector<1x8x1xf32>
    %27 = vector.broadcast %26 : vector<1x8x1xf32> to vector<1x8x256xf32>
    %28 = arith.mulf %0, %27 : vector<1x8x256xf32>
    %c0_16 = arith.constant 0 : index
    %c0_17 = arith.constant 0 : index
    %c0_18 = arith.constant 0 : index
    %29 = vector.load %arg6[%c0_16, %c0_17, %c0_18] : memref<1x8x256xf32, #tpu.memory_space<vmem>>, vector<1x8x256xf32>
    tpu.vector_store %arg6[%c0_16, %c0_17, %c0_18], %28 {strides = array<i32>} : memref<1x8x256xf32, #tpu.memory_space<vmem>>, vector<1x8x256xf32>,
    return
  }
  func.func @transform_0(%arg0: i32) -> (i32, i32, i32) {
    %c0_i32 = arith.constant 0 : i32
    %c0_i32_0 = arith.constant 0 : i32
    %c0_i32_1 = arith.constant 0 : i32
    return %arg0, %c0_i32, %c0_i32_0 : i32, i32, i32
  }
  func.func @transform_1(%arg0: i32) -> (i32, i32) {
    %c0_i32 = arith.constant 0 : i32
    %c0_i32_0 = arith.constant 0 : i32
    %c0_i32_1 = arith.constant 0 : i32
    return %c0_i32, %c0_i32_0 : i32, i32
  }
  func.func @transform_2(%arg0: i32) -> (i32, i32) {
    %c0_i32 = arith.constant 0 : i32
    %c0_i32_0 = arith.constant 0 : i32
    %c0_i32_1 = arith.constant 0 : i32
    return %c0_i32, %c0_i32_0 : i32, i32
  }
  func.func @transform_3(%arg0: i32) -> (i32, i32) {
    %c0_i32 = arith.constant 0 : i32
    %c0_i32_0 = arith.constant 0 : i32
    %c0_i32_1 = arith.constant 0 : i32
    return %c0_i32, %c0_i32_0 : i32, i32
  }
  func.func @transform_4(%arg0: i32) -> (i32, i32) {
    %c0_i32 = arith.constant 0 : i32
    %c0_i32_0 = arith.constant 0 : i32
    %c0_i32_1 = arith.constant 0 : i32
    return %c0_i32, %c0_i32_0 : i32, i32
  }
  func.func @transform_5(%arg0: i32) -> (i32, i32, i32) {
    %c0_i32 = arith.constant 0 : i32
    %c0_i32_0 = arith.constant 0 : i32
    %c0_i32_1 = arith.constant 0 : i32
    return %arg0, %c0_i32, %c0_i32_0 : i32, i32, i32
  }
}

</mosaic_0001>

<bundles_post_ra>
// kernel: tpu_custom_call.1
= control target key start
LH: loop header
LB: loop body
LE: loop exit
PB: predicated region body
PF: predicated region fallthrough
CT: control target
= control target key end

     0   :  { %10 = vsyncpa [#allocation3], 0  ;;  %s938_s0 = inlined_call_operand.hbm [shape: f32[2,8,256], index: 0, kind: input, shape index: {}]   ;;  %s939_s1 = inlined_call_operand.vmem [shape: f32[8,2], index: 1, kind: input, shape index: {}]   ;;  %s940_s2 = inlined_call_operand.vmem [shape: f32[1,2], index: 2, kind: input, shape index: {}]   ;;  %s941_s3 = inlined_call_operand.vmem [shape: f32[2,8], index: 3, kind: input, shape index: {}]   ;;  %s942_s4 = inlined_call_operand.vmem [shape: f32[1,8], index: 4, kind: input, shape index: {}]   ;;  %s943_s5 = inlined_call_operand.hbm [shape: f32[2,8,256], index: 5, kind: output, shape index: {}]  }
   0x1   :  { %12 = vsyncpa [#allocation3 + $0x1], 0 }
   0x2   :  { %13 = vsyncpa [#allocation4], 0 }
   0x3   :  { %15 = vsyncpa [#allocation4 + $0x1], 0  ;;  %s761_s18 = smov 0   ;;  %s763_s19 = smov 0  }
   0x4   :  { %s765_s20 = smov 0   ;;  %s767_s21 = smov 0  }
   0x5 LB: > { %s782_s22 = sadd.s32 4294967295, %s725_s21   ;;  %s541_s23 = sadd.s32 4294967294, %s725_s21   ;;  %s725_s21 = sphi %s767_s21, %s958_s21   ;;  %s721_s20 = sphi %s765_s20, %s957_s20   ;;  %s717_s19 = sphi %s763_s19, %s956_s19   ;;  %s713_s18 = sphi %s761_s18, %s955_s18  }
   0x6   : > { %s786_s24 = sadd.s32 1, %s725_s21   ;;  %s28_s25 = sadd.s32 1, %s721_s20 }
   0x7   : > { %s25_s26 = ssub.s32 %s725_s21, %s786_s24  ;;  %p35_p0 = scmp.ne.s32.totalorder %s721_s20, %s717_s19 }
   0x8   : > { %p26_p1 = scmp.eq.s32.totalorder %s25_s26, 0  ;;  %p36_p2 = scmp.eq.s32.totalorder %s725_s21, 0 }
   0x9   : > { %p41_p3 = scmp.ne.s32.totalorder %s717_s19, %s713_s18  ;;  %p42_p4 = scmp.eq.s32.totalorder %s782_s22, 0 }
   0xa   : > { %s798_s27 = scalar_select %p26_p1, %s721_s20, %s28_s25  }
   0xb   : > { %p800_p5 = por %p36_p2, %p35_p0  ;;  %p804_p6 = por %p42_p4, %p41_p3 }
   0xc   : > { %p149_p7 = scmp.eq.s32.totalorder %s782_s22, 1  ;;  %p155_p8 = scmp.eq.s32.totalorder %s541_s23, 1 }
   0xd   : > { %p589_p10 = scmp.lt.s32.totalorder %s725_s21, 2  ;;  %s187_s7 = sand.u32 1, %s721_s20  }
   0xe   : > { %p811_p11 = por %p149_p7, %p35_p0  ;;  %p815_p12 = por %p155_p8, %p41_p3 }
   0xf   : > { %s561_s8 = sshll.u32 %s725_s21, 8  ;;  %s544_s9 = sshll.u32 %s187_s7, 4 }
  0x10   : > { %s947_s30 = scalar_select %p811_p11, 1, 0 }
  0x11   : > { %s948_s6 = scalar_select %p815_p12, 1, 0 }
  0x12   : > { %s824_s12 = scalar_lea.hbm %s938_s0, %s561_s8  ;;  %s191_s13 = scalar_lea.vmem [#allocation2], %s544_s9 }
  0x13   : > { %s199_s14 = sshll.u32 %s191_s13, 4  ;;  %p828_p13 = pnand %p589_p10, %p800_p5  ;;  %s832_s14 = int_to_ptr.vmem [resolvable:$true] %s199_s14 }
  0x14   : > { %s188_s16 = scalar_lea.sflag [#allocation3], %s187_s7  ;;  %s629_s17 = scalar_lea.hbm %s824_s12, 256 }
  0x15   : > { %p630_p2 = scmp.ne.s32.totalorder %s824_s12, %s629_s17  ;;  %p631_p3 = pneg %p828_p13 }
  0x16   : > { %s634_s26 = scalar_lea.hbm %s938_s0, 512  ;;  %p635_p5 = scmp.lt.u32.totalorder %s824_s12, %s938_s0 }
  0x17   : > { %p632_p4 = pnand %p631_p3, %p630_p2  ;;  %p636_p8 = scmp.lt.u32.totalorder %s634_s26, %s629_s17 }
  0x18   : > { %p638_p9 = scmp.lt.u32.totalorder %s629_s17, %s824_s12 }
  0x19   : > { %p633_p7 = pneg %p632_p4  ;;  %p637_p10 = por %p636_p8, %p635_p5 }
  0x1b   : > { %p639_p0 = por %p638_p9, %p637_p10 }
  0x1d   : > { %p640_p1 = pnand %p639_p0, %p633_p7 }
  0x1f   : > { %643 = shalt.err (!%p640_p1)
}
  0x20   : > { %s644_s7 = scalar_lea.vmem %s832_s14, 256  ;;  %s727_s9 = smov [#allocation2]  }
  0x21   : > { %p645_p2 = scmp.ne.s32.totalorder %s832_s14, %s644_s7  ;;  %s649_s10 = sshll.u32 %s727_s9, 4  ;;  %s650_s10 = int_to_ptr.vmem [resolvable:$false] %s649_s10 }
  0x22   : > { %s651_s11 = scalar_lea.vmem %s650_s10, 512  ;;  %p652_p11 = scmp.lt.s32.totalorder %s832_s14, %s650_s10 }
  0x23   : > { %p647_p4 = pnand %p645_p2, %p631_p3  ;;  %p653_p5 = scmp.lt.s32.totalorder %s651_s11, %s644_s7 }
  0x25   : > { %p648_p12 = pneg %p647_p4  ;;  %p654_p8 = por %p653_p5, %p652_p11 }
  0x27   : > { %p655_p9 = pnand %p654_p8, %p648_p12 }
  0x29   : > { %658 = shalt.err (!%p655_p9)
}
  0x2a   : > { %584 = dma.hbm_to_vmem [thread:$0]  (!%p828_p13), %s824_s12, 256, %s832_s14, %s188_s16  }
  0x2b   : > { %p950_p0 = scmp.lt.s32.totalorder %s725_s21, 3  ;;  %p951_p1 = scmp.ge.s32.totalorder %s725_s21, 1 }
  0x2d   : > { %p205_p3 = pnand %p951_p1, %p950_p0 }
  0x2e   : > { %s866_s13 = sand.u32 (!%p205_p3), 1, %s717_s19  }
  0x2f   : > { %208 = sbr.rel (%p205_p3) target bundleno = 800 (0x320), region = 40  ;;  %s548_s17 = sshll.u32 (!%p205_p3), %s866_s13, 4 }
  0x30   : > { %s211_s23 = scalar_lea.sflag (!%p205_p3), [#allocation3], %s866_s13  ;;  %s214_s15 = scalar_lea.vmem (!%p205_p3), [#allocation2], %s548_s17 }
  0x36   : > { %704 = dma.done.wait (%p804_p6), %s211_s23, 256  }
  0x37   : > { %706 = vsyncadd (%p804_p6), %s211_s23, 4294967040  ;;  %v241_v0 = vld [vmem:[%s214_s15] sm:$0xff]  ;;  %v242_v1 = vld [vmem:[%s214_s15 + $0x8] sm:$0xff]  ;;  %v728_v5 = vmov 0.0   ;;  %vm729_vm0 = vmmov 0   ;;  %v251_v6 = vlaneseq  ;;  %vm264_vm1 = vcmask 1040384  }
  0x38   : > { %v243_v2 = vadd.f32 %v242_v1, %v241_v0  ;;  %v246_v3 = vmax.f32 %v241_v0, %v242_v1  ;;  %v266_v4 = vld [vmem:[%s939_s1] sm:$0xff]  ;;  %567 = vmatprep.subr.mxu0 %v728_v5  ;;  %569 = vmatprep.mubr.msk.f32.mxu0 %vm729_vm0, %v728_v5  ;;  %vm274_vm2 = vcmask 64512   ;;  %vm361_vm3 = vcmask 1041408   ;;  %s562_s7 = sshll.u32 %s782_s22, 8  ;;  %s240_s9 = scalar_lea.vmem [#allocation5], %s548_s17 }
  0x39   : > { %568 = vmatpush3.msra.mxu0 %v266_v4  ;;  %572 = vmatprep.subr.mxu1 %v728_v5  ;;  %v252_v7 = vand.u32 127, %v251_v6  ;;  %v254_v8 = vshrl.u32 %v251_v6, 7  ;;  %v349_v16 = vld [vmem:[%s941_s3] sm:$0x3]  ;;  %vm357_vm4 = vcmask 15360   ;;  %s471_s10 = sshll.u32 %s240_s9, 4  ;;  %s894_s15 = scalar_lea.hbm %s943_s5, %s562_s7  ;;  %s896_s10 = int_to_ptr.vmem [resolvable:$true] %s471_s10 }
  0x3a   : > { %244 = vadd.xlane.f32.xlu0 %v243_v2  ;;  %574 = vmatprep.mubr.msk.f32.mxu1 %vm729_vm0, %v728_v5  ;;  %v550_v17 = vld [vmem:[%s940_s2] ss:$0 sm:$0xff]  ;;  %s457_s12 = scalar_lea.sflag [#allocation4], %s866_s13  ;;  %s659_s22 = scalar_lea.vmem %s896_s10, 256 }
  0x3b   : > { %v255_v10 = vsub.s32 %v252_v7, %v254_v8  ;;  %573 = vmatpush3.msk.msra.mxu1 %vm361_vm3, %v349_v16  ;;  %v552_v22 = vld [vmem:[%s942_s4] ss:$0 sm:$0xff]  ;;  %v447_v31 = vsub.s32 0, %v254_v8  ;;  %p660_p6 = scmp.ne.s32.totalorder %s896_s10, %s659_s22  ;;  %p952_p11 = scmp.ne.s32.totalorder %s947_s30, 0 }
  0x3c   : > { %s730_s17 = smov [#allocation5]  }
  0x3d   : > { %p661_p12 = pnand %p660_p6, %p952_p11  ;;  %s663_s14 = sshll.u32 %s730_s17, 4  ;;  %s664_s14 = int_to_ptr.vmem [resolvable:$false] %s663_s14 }
  0x3e   : > { %247 = vmax.xlane.f32.xlu0 %v246_v3  ;;  %s665_s29 = scalar_lea.vmem %s664_s14, 512  ;;  %p666_p7 = scmp.lt.s32.totalorder %s896_s10, %s664_s14 }
  0x3f   : > { %p662_p13 = pneg %p661_p12  ;;  %p667_p10 = scmp.lt.s32.totalorder %s665_s29, %s659_s22 }
  0x41   : > { %p668_p2 = por %p667_p10, %p666_p7 }
  0x43   : > { %p669_p4 = pnand %p668_p2, %p662_p13 }
  0xc7   : > { %v245_v9 = vpop.xlane.xlu0 %244 }
  0xc8   : > { %v249_v11 = vmul.f32 0.00390625, %v245_v9 }
  0xca   : > { %v256_v13 = vrot.slane %v249_v11, %v255_v10 }
  0xcb   : > { %v248_v12 = vpop.xlane.xlu0 %247 }
  0xcc   : > { %v262_v14 = vrot.slane %v248_v12, %v255_v10 }
  0xce   : > { %v265_v15 = vsel %vm264_vm1, %v256_v13, %v262_v14 }
  0xcf   : > { %570 = vmatmul.mubr.msk.f32.vlgmr.msra.gmra.mrb[0].mxu0 %vm274_vm2, %v265_v15 }
 0x1a2   : > { %v344_v18 = vpop.f32.mrb[0].mxu0 }
 0x1a3   : > { %v345_v19 = vadd.f32 %v550_v17, %v344_v18  ;;  %v571_v20 = vpop.f32.mrb[1].mxu0 }
 0x1a5   : > { %v348_v21 = vmax.f32 %v345_v19, 0.0 }
 0x1a7   : > { %575 = vmatmul.mubr.msk.f32.vlgmr.msra.gmra.mrb[0].mxu1 %vm357_vm4, %v348_v21 }
 0x27a   : > { %v431_v23 = vpop.f32.mrb[0].mxu1 }
 0x27b   : > { %v432_v24 = vadd.f32 %v552_v22, %v431_v23  ;;  %v576_v25 = vpop.f32.mrb[1].mxu1 }
 0x27d   : > { %v436_v26 = vrot.slane %v432_v24, 1 }
 0x27f   : > { %v438_v27 = vadd.f32 %v436_v26, %v432_v24 }
 0x281   : > { %v555_v28 = vmul.f32 -1.442695, %v438_v27 }
 0x283   : > { %625 = vpow2.f32 %v555_v28 }
 0x28d   : > { %v626_v29 = vpop.eup %625 }
 0x28e   : > { %v442_v30 = vadd.f32 1.0, %v626_v29 }
 0x290   : > { %627 = vrcp.f32 %v442_v30 }
 0x29a   : > { %v628_v32 = vpop.eup %627 }
 0x29b   : > { %v448_v33 = vrot.slane %v628_v32, %v447_v31 }
 0x29d   : > { %450 = vbcast.lane.b32.xlu1 %v448_v33, 256 }
 0x30f   : > { %v451_v34 = vpop.permute.xlu1 %450 }
 0x310   : > { %v452_v35 = vmul.f32 %v451_v34, %v241_v0  ;;  %v453_v36 = vmul.f32 %v451_v34, %v242_v1 }
 0x312   : > { %454 = vst [vmem:[%s240_s9] sm:$0xff] %v452_v35  ;;  %455 = vst [vmem:[%s240_s9 + $0x8] sm:$0xff] %v453_v36 }
 0x313   : > { %672 = shalt.err (!%p669_p4)
}
 0x314   : > { %s673_s13 = scalar_lea.hbm %s894_s15, 256  ;;  %s677_s26 = scalar_lea.hbm %s943_s5, 512 }
 0x315   : > { %p674_p5 = scmp.ne.s32.totalorder %s894_s15, %s673_s13  ;;  %p678_p0 = scmp.lt.u32.totalorder %s894_s15, %s943_s5 }
 0x316   : > { %p679_p1 = scmp.lt.u32.totalorder %s677_s26, %s673_s13  ;;  %p681_p6 = scmp.lt.u32.totalorder %s673_s13, %s894_s15 }
 0x317   : > { %p675_p8 = pnand %p674_p5, %p952_p11 }
 0x318   : > { %p680_p3 = por %p679_p1, %p678_p0 }
 0x319   : > { %p676_p9 = pneg %p675_p8 }
 0x31a   : > { %p682_p12 = por %p681_p6, %p680_p3 }
 0x31c   : > { %p683_p13 = pnand %p682_p12, %p676_p9 }
 0x31e   : > { %686 = shalt.err (!%p683_p13)
}
 0x31f   : > { %579 = dma.vmem_to_hbm [thread:$0]  (%p952_p11), %s896_s10, 256, %s894_s15, %s457_s12  }
 0x320 PF: > { %s483_s7 = sand.u32 1, %s713_s18   ;;  %p953_p7 = scmp.ne.s32.totalorder %s948_s6, 0 }
 0x321   : > { %p954_p10 = scmp.ge.s32.totalorder %s725_s21, 2  ;;  %s484_s9 = scalar_lea.sflag [#allocation4], %s483_s7 }
 0x323   : > { %p586_p2 = pnand %p954_p10, %p953_p7 }
 0x325   : > { %708 = dma.done.wait (!%p586_p2), %s484_s9, 256  }
 0x326   : > { %710 = vsyncadd (!%p586_p2), %s484_s9, 4294967040  ;;  %p18_p4 = scmp.ge.s32.totalorder %s786_s24, 4   ;;  %s955_s18 = smov %s717_s19 }
 0x327   : > { %s956_s19 = smov %s721_s20  ;;  %s957_s20 = smov %s798_s27 }
 0x328   : > { %s958_s21 = smov %s786_s24  ;;  %20 = sbr.rel (!%p18_p4) target bundleno = 5 (0x5), region = 85 }
 0x32f   :  { %489 = vsyncpa [#allocation3], 1 }
 0x330   :  { %491 = vsyncpa [#allocation3 + $0x1], 1 }
 0x331   :  { %492 = vsyncpa [#allocation4], 1 }
 0x332   :  { %494 = vsyncpa [#allocation4 + $0x1], 1 }

</bundles_post_ra>
